<compile_context>
chip_gen: v7x
topology: tpu7x:2x2x1
jax: 0.10.0
libtpu: 0.0.40
codegen_flags: <defaults>
</compile_context>

<pallas_src>
import functools

import jax
import jax.numpy as jnp
from jax import lax
from jax.experimental import pallas as pl
from jax.experimental.pallas import tpu as pltpu

EPS = 1e-6  # diffusers ResnetBlock2D GroupNorm eps


def _query_vmem_capacity():
    try:
        return int(pltpu.get_tpu_info().vmem_capacity_bytes)
    except Exception:
        return 64 * 1024 * 1024  # conservative fallback (v7x-sized)


_VMEM_CAP = _query_vmem_capacity()
_VMEM_LIMIT_BYTES = min(int(_VMEM_CAP * 0.65), 96 * 1024 * 1024)


# ----------------------------- in-kernel helpers -----------------------------

def _halo_copies(src_hbm, n, r0, buf, sems, slot, *, rows, W, H):
    """DMA descriptors for rows [r0-1, r0+rows] (clamped) of src_hbm[n] into buf[slot].
    Destination is a dense (rows+2, W, C) slab.  Out-of-range halo rows are fetched from a
    clamped (valid) source row and later zeroed by the border mask, so every DMA is in bounds."""
    mk = pltpu.make_async_copy
    return (
        mk(src_hbm.at[n, pl.ds(jnp.maximum(r0 - 1, 0), 1)],
           buf.at[slot, pl.ds(0, 1)], sems.at[0, slot]),
        mk(src_hbm.at[n, pl.ds(r0, rows)],
           buf.at[slot, pl.ds(1, rows)], sems.at[1, slot]),
        mk(src_hbm.at[n, pl.ds(jnp.minimum(r0 + rows, H - 1), 1)],
           buf.at[slot, pl.ds(rows + 1, 1)], sems.at[2, slot]),
    )


def _start_halo(src_hbm, n, r0, buf, sems, slot, *, rows, W, H):
    for c in _halo_copies(src_hbm, n, r0, buf, sems, slot, rows=rows, W=W, H=H):
        c.start()


def _wait_halo(src_hbm, n, r0, buf, sems, slot, *, rows, W, H):
    for c in _halo_copies(src_hbm, n, r0, buf, sems, slot, rows=rows, W=W, H=H):
        c.wait()


def _build_taps(raw_ref, slot, scale, shift, r0, taps_ref, *, rows, W, H, compute_dtype):
    """GN-normalize (folded scale/shift) + SiLU the raw slab, zero the out-of-image halo rows,
    then build the three column-shifted tap slabs (dx = -1, 0, +1) once and cache them in
    compute dtype.  All subsequent Cout tiles reuse them with aligned slices only."""
    C = raw_ref.shape[-1]
    npix = (rows + 2) * W

    a = raw_ref[slot].astype(jnp.float32) * scale + shift          # (rows+2, W, C)
    a = a * jax.nn.sigmoid(a)                                       # SiLU

    row = lax.broadcasted_iota(jnp.int32, (rows + 2, W, 1), 0)
    oob = ((row == 0) & (r0 == 0)) | ((row == rows + 1) & (r0 + rows >= H))
    a = jnp.where(oob, 0.0, a)

    flat = a.reshape(npix, C)                                       # W % 8 == 0 -> free view
    col = lax.broadcasted_iota(jnp.int32, (rows + 2, W, 1), 1).reshape(npix, 1)
    zrow = jnp.zeros((1, C), jnp.float32)
    # left[i]  = a[i-1] with column 0  zero  (tap dx=0: image col c-1)
    # right[i] = a[i+1] with column W-1 zero (tap dx=2: image col c+1)
    left = jnp.where(col == 0, 0.0, jnp.concatenate([zrow, flat[:npix - 1]], axis=0))
    right = jnp.where(col == W - 1, 0.0, jnp.concatenate([flat[1:], zrow], axis=0))

    taps_ref[0] = left.astype(compute_dtype)
    taps_ref[1] = flat.astype(compute_dtype)
    taps_ref[2] = right.astype(compute_dtype)


def _conv3x3(taps_ref, w_ref, *, rows, W):
    """9-tap conv accumulated in a local f32 value (no VMEM accumulator round-trips).
    Row (dy) shifts are aligned slices of the flattened slab; column (dx) shifts are the cached
    pre-shifted tap slabs."""
    acc = None
    for dy in range(3):
        for dx in range(3):
            lhs = taps_ref[dx, pl.ds(dy * W, rows * W), :]
            p = jnp.dot(lhs, w_ref[dy, dx], preferred_element_type=jnp.float32)
            acc = p if acc is None else acc + p
    return acc  # (rows*W, tco) f32


# --------------------------------- kernels ------------------------------------

def _channel_stats_kernel(x_ref, sum_ref, sq_ref):
    """Per-(batch, row-strip, channel) partial sum and sum-of-squares of x."""
    C = x_ref.shape[-1]
    xv = x_ref[0].reshape(-1, C).astype(jnp.float32)
    sum_ref[0, 0] = jnp.sum(xv, axis=0, keepdims=True)
    sq_ref[0, 0] = jnp.sum(xv * xv, axis=0, keepdims=True)


def _gn_silu_conv_kernel(x_any, sc_ref, sh_ref, w_ref, b_ref,
                         h_ref, hsum_ref, hsq_ref,
                         xraw, taps, sems,
                         *, H, W, rows, compute_dtype):
    """Fused GroupNorm(affine-folded) + SiLU + 3x3 conv, one (batch, row-strip, cout-tile) grid
    point.  Halo DMA is double-buffered and, together with the activation / tap build, runs only
    once per strip (co == 0).  Also emits per-strip partial per-channel stats of the conv output
    for the next GroupNorm."""
    n, r, co = pl.program_id(0), pl.program_id(1), pl.program_id(2)
    nr = pl.num_programs(1)
    r0 = r * rows
    slot = r % 2

    @pl.when(co == 0)
    def _prep():
        @pl.when(r == 0)
        def _():  # prime the pipeline at the first strip of each image
            _start_halo(x_any, n, 0, xraw, sems, 0, rows=rows, W=W, H=H)

        _wait_halo(x_any, n, r0, xraw, sems, slot, rows=rows, W=W, H=H)

        @pl.when(r + 1 < nr)
        def _():  # prefetch the next strip while this one is being computed
            _start_halo(x_any, n, r0 + rows, xraw, sems, 1 - slot, rows=rows, W=W, H=H)

        _build_taps(xraw, slot, sc_ref[...], sh_ref[...], r0, taps,
                    rows=rows, W=W, H=H, compute_dtype=compute_dtype)

    hb = _conv3x3(taps, w_ref, rows=rows, W=W) + b_ref[...]          # (rows*W, tco) f32
    h_ref[0] = hb.reshape(rows, W, -1).astype(h_ref.dtype)
    hsum_ref[0, 0] = jnp.sum(hb, axis=0, keepdims=True)
    hsq_ref[0, 0] = jnp.sum(hb * hb, axis=0, keepdims=True)


def _gn_silu_conv_shortcut_kernel(h_any, sc_ref, sh_ref, w_ref, b_ref,
                                  x_ref, ws_ref, bs_ref,
                                  o_ref,
                                  hraw, taps, sems,
                                  *, H, W, rows, inv_scale, compute_dtype):
    """Fused GN2 + SiLU + dropout(p=0) + 3x3 conv2 + 1x1 shortcut + residual add + output scale."""
    n, r, co = pl.program_id(0), pl.program_id(1), pl.program_id(2)
    nr = pl.num_programs(1)
    r0 = r * rows
    slot = r % 2

    @pl.when(co == 0)
    def _prep():
        @pl.when(r == 0)
        def _():
            _start_halo(h_any, n, 0, hraw, sems, 0, rows=rows, W=W, H=H)

        _wait_halo(h_any, n, r0, hraw, sems, slot, rows=rows, W=W, H=H)

        @pl.when(r + 1 < nr)
        def _():
            _start_halo(h_any, n, r0 + rows, hraw, sems, 1 - slot, rows=rows, W=W, H=H)

        _build_taps(hraw, slot, sc_ref[...], sh_ref[...], r0, taps,
                    rows=rows, W=W, H=H, compute_dtype=compute_dtype)

    acc = _conv3x3(taps, w_ref, rows=rows, W=W)                       # (rows*W, tco) f32
    xv = x_ref[0].reshape(rows * W, -1).astype(compute_dtype)
    acc = acc + jnp.dot(xv, ws_ref[...], preferred_element_type=jnp.float32)  # 1x1 shortcut
    out = (acc + b_ref[...] + bs_ref[...]) * inv_scale
    o_ref[0] = out.reshape(rows, W, -1).astype(o_ref.dtype)


# -------------------------------- wrappers ------------------------------------

def _pick_row_tile(h, target):
    t = max(1, min(h, int(target)))
    while h % t:
        t -= 1
    return t


def _pick_cout_tile(c, target):
    """Cout tile: full width, or the largest 128-multiple divisor <= target (lane-dense stores,
    full MXU tiles)."""
    if c <= target or c < 128:
        return c
    if c % 128 == 0:
        best = 128
        for t in range(256, int(target) + 1, 128):
            if c % t == 0:
                best = t
        return best
    # TODO(synk): pad Cout that is not a lane multiple (e.g. 320) instead of using the full width.
    return c


def _compiler_params(dims):
    return pltpu.CompilerParams(dimension_semantics=dims,
                                vmem_limit_bytes=_VMEM_LIMIT_BYTES)


def _channel_stats(x, rows):
    N, H, W, C = x.shape
    nr = H // rows
    return pl.pallas_call(
        _channel_stats_kernel,
        out_shape=(jax.ShapeDtypeStruct((N, nr, 1, C), jnp.float32),
                   jax.ShapeDtypeStruct((N, nr, 1, C), jnp.float32)),
        grid=(N, nr),
        in_specs=[pl.BlockSpec((1, rows, W, C), lambda n, r: (n, r, 0, 0))],
        out_specs=(pl.BlockSpec((1, 1, 1, C), lambda n, r: (n, r, 0, 0)),
                   pl.BlockSpec((1, 1, 1, C), lambda n, r: (n, r, 0, 0))),
        compiler_params=_compiler_params(("parallel", "parallel")),
    )(x)


def _gn_affine(csum, csq, gamma, beta, groups, hw, eps=EPS):
    """Fold GroupNorm stats + affine into per-(batch, channel) scale/shift (tiny, pure JAX).
    csum/csq: (N, n_strips, 1, C) per-strip partials."""
    s = csum.sum(axis=(1, 2))                     # (N, C)
    q = csq.sum(axis=(1, 2))
    N, C = s.shape
    cg = C // groups
    sg = s.reshape(N, groups, cg).sum(-1)
    qg = q.reshape(N, groups, cg).sum(-1)
    cnt = float(hw * cg)
    mean = sg / cnt
    # E[x^2]-mean^2 can dip slightly below 0 in f32: clamp.
    var = jnp.maximum(qg / cnt - mean * mean, 0.0)
    inv = lax.rsqrt(var + eps)
    mean_c = jnp.repeat(mean, cg, axis=1)
    inv_c = jnp.repeat(inv, cg, axis=1)
    scale = inv_c * gamma[None, :].astype(jnp.float32)
    shift = beta[None, :].astype(jnp.float32) - mean_c * scale
    return scale.reshape(N, 1, C), shift.reshape(N, 1, C)


def _gn_silu_conv3x3(x, scale, shift, w_hwio, b, *, rows, tco, compute_dtype, out_dtype):
    N, H, W, Cin = x.shape
    Cout = w_hwio.shape[-1]
    nr, nco = H // rows, Cout // tco
    kern = functools.partial(_gn_silu_conv_kernel, H=H, W=W, rows=rows,
                             compute_dtype=compute_dtype)
    return pl.pallas_call(
        kern,
        out_shape=(jax.ShapeDtypeStruct((N, H, W, Cout), out_dtype),
                   jax.ShapeDtypeStruct((N, nr, 1, Cout), jnp.float32),
                   jax.ShapeDtypeStruct((N, nr, 1, Cout), jnp.float32)),
        grid=(N, nr, nco),
        in_specs=[
            pl.BlockSpec(memory_space=pl.ANY),                             # x in HBM; manual halo DMA
            pl.BlockSpec((1, 1, Cin), lambda n, r, co: (n, 0, 0)),         # folded GN scale
            pl.BlockSpec((1, 1, Cin), lambda n, r, co: (n, 0, 0)),         # folded GN shift
            pl.BlockSpec((3, 3, Cin, tco), lambda n, r, co: (0, 0, 0, co)),
            pl.BlockSpec((1, tco), lambda n, r, co: (0, co)),
        ],
        out_specs=(
            pl.BlockSpec((1, rows, W, tco), lambda n, r, co: (n, r, 0, co)),
            pl.BlockSpec((1, 1, 1, tco), lambda n, r, co: (n, r, 0, co)),
            pl.BlockSpec((1, 1, 1, tco), lambda n, r, co: (n, r, 0, co)),
        ),
        scratch_shapes=[
            pltpu.VMEM((2, rows + 2, W, Cin), x.dtype),                    # double-buffered raw halo slab
            pltpu.VMEM((3, (rows + 2) * W, Cin), compute_dtype),           # cached pre-shifted taps
            pltpu.SemaphoreType.DMA((3, 2)),
        ],
        compiler_params=_compiler_params(("parallel", "arbitrary", "arbitrary")),
    )(x, scale, shift, w_hwio.astype(compute_dtype), b.reshape(1, Cout).astype(jnp.float32))


def _gn_silu_conv3x3_shortcut(h, scale, shift, w_hwio, b, x, ws_io, bs,
                              *, rows, tco, compute_dtype, inv_scale, out_dtype):
    N, H, W, C1 = h.shape
    Cin = x.shape[-1]
    Cout = w_hwio.shape[-1]
    nr, nco = H // rows, Cout // tco
    kern = functools.partial(_gn_silu_conv_shortcut_kernel, H=H, W=W, rows=rows,
                             inv_scale=inv_scale, compute_dtype=compute_dtype)
    return pl.pallas_call(
        kern,
        out_shape=jax.ShapeDtypeStruct((N, H, W, Cout), out_dtype),
        grid=(N, nr, nco),
        in_specs=[
            pl.BlockSpec(memory_space=pl.ANY),                             # h1 in HBM; manual halo DMA
            pl.BlockSpec((1, 1, C1), lambda n, r, co: (n, 0, 0)),
            pl.BlockSpec((1, 1, C1), lambda n, r, co: (n, 0, 0)),
            pl.BlockSpec((3, 3, C1, tco), lambda n, r, co: (0, 0, 0, co)),
            pl.BlockSpec((1, tco), lambda n, r, co: (0, co)),
            pl.BlockSpec((1, rows, W, Cin), lambda n, r, co: (n, r, 0, 0)),  # x rows for 1x1 shortcut
            pl.BlockSpec((Cin, tco), lambda n, r, co: (0, co)),
            pl.BlockSpec((1, tco), lambda n, r, co: (0, co)),
        ],
        out_specs=pl.BlockSpec((1, rows, W, tco), lambda n, r, co: (n, r, 0, co)),
        scratch_shapes=[
            pltpu.VMEM((2, rows + 2, W, C1), h.dtype),
            pltpu.VMEM((3, (rows + 2) * W, C1), compute_dtype),
            pltpu.SemaphoreType.DMA((3, 2)),
        ],
        compiler_params=_compiler_params(("parallel", "arbitrary", "arbitrary")),
    )(h, scale, shift, w_hwio.astype(compute_dtype), b.reshape(1, Cout).astype(jnp.float32),
      x, ws_io.astype(compute_dtype), bs.reshape(1, Cout).astype(jnp.float32))


def resnet_block2d_forward(x_nchw, params, *, groups, output_scale_factor=1.0,
                           compute_dtype=jnp.bfloat16, h1_dtype=jnp.bfloat16,
                           block_rows=None, block_cout=256):
    """Pallas implementation of ResnetBlock2DAdapter.forward (temb=None, dropout p=0).
    compute_dtype: MXU operand dtype (f32 accumulation & f32 GN statistics regardless).
    h1_dtype: storage dtype of the intermediate activation (GN2 stats are taken from the f32
    pre-cast conv output; normalization is applied to the stored values)."""
    x = jnp.transpose(x_nchw, (0, 2, 3, 1)).astype(jnp.float32)   # NCHW -> NHWC
    N, H, W, Cin = x.shape
    C1 = params["w1_hwio"].shape[-1]
    C2 = params["w2_hwio"].shape[-1]

    if block_rows is None:
        # Keep one f32 activation slab temporary comfortably inside VMEM; smaller default on v7x.
        slab_budget = 6 << 20
        cmax = max(Cin, C1)
        block_rows = max(1, min(16 if _VMEM_CAP >= (96 << 20) else 8,
                                slab_budget // (W * cmax * 4) - 2))
    rows = _pick_row_tile(H, block_rows)
    tco1 = _pick_cout_tile(C1, block_cout)
    tco2 = _pick_cout_tile(C2, block_cout)

    # GroupNorm-1 statistics (one light pass over x).
    xs, xq = _channel_stats(x, rows)
    sc1, sh1 = _gn_affine(xs, xq, params["gamma1"], params["beta1"], groups, H * W)

    # GN1 + SiLU + conv1 (fused); also emits per-strip per-channel stats of h1 for GN2.
    h1, hs, hq = _gn_silu_conv3x3(x, sc1, sh1, params["w1_hwio"], params["b1"],
                                  rows=rows, tco=tco1, compute_dtype=compute_dtype,
                                  out_dtype=h1_dtype)
    sc2, sh2 = _gn_affine(hs, hq, params["gamma2"], params["beta2"], groups, H * W)

    # GN2 + SiLU + dropout(p=0, identity) + conv2 + 1x1 shortcut + add + scale, fused.
    out = _gn_silu_conv3x3_shortcut(h1, sc2, sh2, params["w2_hwio"], params["b2"],
                                    x, params["ws_io"], params["bs"],
                                    rows=rows, tco=tco2, compute_dtype=compute_dtype,
                                    inv_scale=1.0 / float(output_scale_factor),
                                    out_dtype=x_nchw.dtype)
    return jnp.transpose(out, (0, 3, 1, 2))   # NHWC -> NCHW


# ------------------------------ pure-JAX reference ----------------------------

def _group_norm_ref(x_nchw, gamma, beta, groups, eps=EPS):
    N, C, H, W = x_nchw.shape
    xg = x_nchw.reshape(N, groups, C // groups, H, W)
    mean = xg.mean(axis=(2, 3, 4), keepdims=True)
    var = xg.var(axis=(2, 3, 4), keepdims=True)
    xn = ((xg - mean) / jnp.sqrt(var + eps)).reshape(N, C, H, W)
    return xn * gamma[None, :, None, None] + beta[None, :, None, None]


def _conv_ref(x_nchw, w_oihw, b, padding):
    y = lax.conv_general_dilated(
        x_nchw, w_oihw, window_strides=(1, 1), padding=padding,
        dimension_numbers=("NCHW", "OIHW", "NCHW"))
    return y + b[None, :, None, None]


def _ref_forward(x, p, *, groups, output_scale_factor=1.0):
    silu = lambda t: t * jax.nn.sigmoid(t)
    h = silu(_group_norm_ref(x, p["gamma1"], p["beta1"], groups))
    h = _conv_ref(h, p["w1_oihw"], p["b1"], [(1, 1), (1, 1)])
    h = silu(_group_norm_ref(h, p["gamma2"], p["beta2"], groups))
    h = _conv_ref(h, p["w2_oihw"], p["b2"], [(1, 1), (1, 1)])
    sc = _conv_ref(x, p["ws_oihw"], p["bs"], [(0, 0), (0, 0)])
    return (sc + h) / output_scale_factor


def _make_params(key, cin, cout):
    ks = jax.random.split(key, 10)
    p = {
        "gamma1": 1.0 + 0.1 * jax.random.normal(ks[0], (cin,), jnp.float32),
        "beta1": 0.1 * jax.random.normal(ks[1], (cin,), jnp.float32),
        "w1_oihw": 0.1 * jax.random.normal(ks[2], (cout, cin, 3, 3), jnp.float32),
        "b1": 0.1 * jax.random.normal(ks[3], (cout,), jnp.float32),
        "gamma2": 1.0 + 0.1 * jax.random.normal(ks[4], (cout,), jnp.float32),
        "beta2": 0.1 * jax.random.normal(ks[5], (cout,), jnp.float32),
        "w2_oihw": 0.1 * jax.random.normal(ks[6], (cout, cout, 3, 3), jnp.float32),
        "b2": 0.1 * jax.random.normal(ks[7], (cout,), jnp.float32),
        "ws_oihw": 0.1 * jax.random.normal(ks[8], (cout, cin, 1, 1), jnp.float32),
        "bs": 0.1 * jax.random.normal(ks[9], (cout,), jnp.float32),
    }
    # Kernel-layout views: OIHW -> HWIO for 3x3 convs, (Cout, Cin, 1, 1) -> (Cin, Cout) for 1x1.
    p["w1_hwio"] = jnp.transpose(p["w1_oihw"], (2, 3, 1, 0))
    p["w2_hwio"] = jnp.transpose(p["w2_oihw"], (2, 3, 1, 0))
    p["ws_io"] = jnp.transpose(p["ws_oihw"][:, :, 0, 0], (1, 0))
    return p


# ------------------------------------ main -------------------------------------

if __name__ == "__main__":
    N, Cin, Cout, H, W = 2, 8, 16, 16, 16
    GROUPS = 2

    params = _make_params(jax.random.PRNGKey(0), Cin, Cout)
    x = jax.random.normal(jax.random.PRNGKey(42), (N, Cin, H, W), jnp.float32)  # NCHW input

    ref = jax.block_until_ready(_ref_forward(x, params, groups=GROUPS))

    # 1) Full-precision path (f32 MXU operands, f32 h1): strict check.  block_rows=8 -> 2 row
    #    strips per image, exercising the double-buffered halo DMA and per-strip stats partials.
    out = resnet_block2d_forward(x, params, groups=GROUPS,
                                 compute_dtype=jnp.float32, h1_dtype=jnp.float32,
                                 block_rows=8)
    out = jax.block_until_ready(out)
    assert out.shape == (N, Cout, H, W), out.shape
    max_err = float(jnp.max(jnp.abs(out - ref)))
    if not jnp.allclose(out, ref, atol=2e-3, rtol=2e-3):
        raise AssertionError(f"Pallas f32 output mismatch vs reference, max abs err={max_err}")

    # 2) Default performance path (bf16 MXU operands + bf16 h1, f32 accumulation / GN stats).
    out_fast = resnet_block2d_forward(x, params, groups=GROUPS, block_rows=8)
    out_fast = jax.block_until_ready(out_fast)
    fast_err = float(jnp.max(jnp.abs(out_fast.astype(jnp.float32) - ref)))
    if not fast_err < 0.25:
        raise AssertionError(f"Pallas bf16 output mismatch vs reference, max abs err={fast_err}")

    # 3) Cout-tiled path (Cout=256, tco=128 -> 2 cout tiles): exercises the cached-activation
    #    strip reuse across cout tiles and lane-dense 128-wide output tiles.
    params2 = _make_params(jax.random.PRNGKey(1), Cin, 256)
    ref2 = jax.block_until_ready(_ref_forward(x, params2, groups=GROUPS))
    out2 = resnet_block2d_forward(x, params2, groups=GROUPS,
                                  compute_dtype=jnp.float32, h1_dtype=jnp.float32,
                                  block_rows=8, block_cout=128)
    out2 = jax.block_until_ready(out2)
    err2 = float(jnp.max(jnp.abs(out2 - ref2)))
    if not jnp.allclose(out2, ref2, atol=3e-3, rtol=3e-3):
        raise AssertionError(f"Pallas co-tiled output mismatch vs reference, max abs err={err2}")

    print("KERNEL_OK")
</pallas_src>

<mosaic_0001>
module attributes {stable_mosaic.version = 11 : i64} {
  func.func @_channel_stats_kernel(%arg0: i32, %arg1: i32, %arg2: memref<1x8x16x8xf32, #tpu.memory_space<vmem>>, %arg3: memref<1x1x1x8xf32, #tpu.memory_space<vmem>>, %arg4: memref<1x1x1x8xf32, #tpu.memory_space<vmem>>) attributes {dimension_semantics = [#tpu.dimension_semantics<parallel>, #tpu.dimension_semantics<parallel>], iteration_bounds = array<i64: 2, 2>, scalar_prefetch = 0 : i64, scratch_operands = 0 : i64, tpu.core_type = #tpu.core_type<tc>, window_params = [{transform_indices = @transform_0, window_bounds = array<i64: 1, 8, 16, 8>}, {transform_indices = @transform_1, window_bounds = array<i64: 1, 1, 1, 8>}, {transform_indices = @transform_2, window_bounds = array<i64: 1, 1, 1, 8>}]} {
    %c0 = arith.constant 0 : index
    %c0_0 = arith.constant 0 : index
    %c0_1 = arith.constant 0 : index
    %c0_2 = arith.constant 0 : index
    %0 = vector.load %arg2[%c0, %c0_0, %c0_1, %c0_2] : memref<1x8x16x8xf32, #tpu.memory_space<vmem>>, vector<1x8x16x8xf32>
    %1 = vector.shape_cast %0 : vector<1x8x16x8xf32> to vector<8x16x8xf32>
    %2 = vector.shape_cast %1 : vector<8x16x8xf32> to vector<128x8xf32>
    %cst = arith.constant dense<0.000000e+00> : vector<8xf32>
    %3 = vector.multi_reduction <add>, %2, %cst [0] : vector<128x8xf32> to vector<8xf32>
    %4 = vector.shape_cast %3 : vector<8xf32> to vector<1x8xf32>
    %c0_3 = arith.constant 0 : index
    %c0_4 = arith.constant 0 : index
    %c0_5 = arith.constant 0 : index
    %c0_6 = arith.constant 0 : index
    %5 = vector.load %arg3[%c0_3, %c0_4, %c0_5, %c0_6] : memref<1x1x1x8xf32, #tpu.memory_space<vmem>>, vector<1x1x1x8xf32>
    %6 = vector.shape_cast %5 : vector<1x1x1x8xf32> to vector<1x8xf32>
    %7 = vector.shape_cast %4 : vector<1x8xf32> to vector<1x1x1x8xf32>
    tpu.vector_store %arg3[%c0_3, %c0_4, %c0_5, %c0_6], %7 {strides = array<i32>} : memref<1x1x1x8xf32, #tpu.memory_space<vmem>>, vector<1x1x1x8xf32>,
    %8 = arith.mulf %2, %2 : vector<128x8xf32>
    %cst_7 = arith.constant dense<0.000000e+00> : vector<8xf32>
    %9 = vector.multi_reduction <add>, %8, %cst_7 [0] : vector<128x8xf32> to vector<8xf32>
    %10 = vector.shape_cast %9 : vector<8xf32> to vector<1x8xf32>
    %c0_8 = arith.constant 0 : index
    %c0_9 = arith.constant 0 : index
    %c0_10 = arith.constant 0 : index
    %c0_11 = arith.constant 0 : index
    %11 = vector.load %arg4[%c0_8, %c0_9, %c0_10, %c0_11] : memref<1x1x1x8xf32, #tpu.memory_space<vmem>>, vector<1x1x1x8xf32>
    %12 = vector.shape_cast %11 : vector<1x1x1x8xf32> to vector<1x8xf32>
    %13 = vector.shape_cast %10 : vector<1x8xf32> to vector<1x1x1x8xf32>
    tpu.vector_store %arg4[%c0_8, %c0_9, %c0_10, %c0_11], %13 {strides = array<i32>} : memref<1x1x1x8xf32, #tpu.memory_space<vmem>>, vector<1x1x1x8xf32>,
    return
  }
  func.func @transform_0(%arg0: i32, %arg1: i32) -> (i32, i32, i32, i32) {
    %c0_i32 = arith.constant 0 : i32
    %c0_i32_0 = arith.constant 0 : i32
    %c0_i32_1 = arith.constant 0 : i32
    return %arg0, %arg1, %c0_i32, %c0_i32_0 : i32, i32, i32, i32
  }
  func.func @transform_1(%arg0: i32, %arg1: i32) -> (i32, i32, i32, i32) {
    %c0_i32 = arith.constant 0 : i32
    %c0_i32_0 = arith.constant 0 : i32
    %c0_i32_1 = arith.constant 0 : i32
    return %arg0, %arg1, %c0_i32, %c0_i32_0 : i32, i32, i32, i32
  }
  func.func @transform_2(%arg0: i32, %arg1: i32) -> (i32, i32, i32, i32) {
    %c0_i32 = arith.constant 0 : i32
    %c0_i32_0 = arith.constant 0 : i32
    %c0_i32_1 = arith.constant 0 : i32
    return %arg0, %arg1, %c0_i32, %c0_i32_0 : i32, i32, i32, i32
  }
}

</mosaic_0001>

<bundles_post_ra>
// kernel: tpu_custom_call.1
= control target key start
LH: loop header
LB: loop body
LE: loop exit
PB: predicated region body
PF: predicated region fallthrough
CT: control target
= control target key end

     0   :  { %8 = vsyncpa [#allocation3], 0  ;;  %s902_s0 = inlined_call_operand.vmem [shape: f32[2,16,16,8], index: 0, kind: input, shape index: {}]   ;;  %s903_s1 = inlined_call_operand.hbm [shape: f32[2,2,1,8], index: 1, kind: output, shape index: {0}]   ;;  %s904_s2 = inlined_call_operand.hbm [shape: f32[2,2,1,8], index: 2, kind: output, shape index: {1}]  }
   0x1   :  { %10 = vsyncpa [#allocation3 + $0x1], 0 }
   0x2   :  { %11 = vsyncpa [#allocation5], 0 }
   0x3   :  { %13 = vsyncpa [#allocation5 + $0x1], 0  ;;  %s673_s9 = smov 0   ;;  %s675_s10 = smov 0  }
   0x4   :  { %s677_s11 = smov 0   ;;  %s679_s12 = smov 0  }
   0x5   :  { %s681_s13 = smov 0   ;;  %s683_s14 = smov 0  }
   0x6   :  { %s685_s15 = smov 0   ;;  %s687_s16 = smov 0  }
   0x7 LB: > { %s437_s17 = sadd.s32 4294967295, %s654_s16   ;;  %s438_s18 = sadd.s32 4294967294, %s654_s16   ;;  %s654_s16 = sphi %s687_s16, %s19_s16   ;;  %s650_s15 = sphi %s685_s15, %s913_s15   ;;  %s646_s14 = sphi %s683_s14, %s912_s14   ;;  %s642_s13 = sphi %s681_s13, %s911_s13   ;;  %s638_s12 = sphi %s679_s12, %s910_s12   ;;  %s634_s11 = sphi %s677_s11, %s909_s11   ;;  %s630_s10 = sphi %s675_s10, %s908_s10   ;;  %s626_s9 = sphi %s673_s9, %s907_s9  }
   0x8   : > { %s28_s19 = sadd.s32 1, %s646_s14  ;;  %s31_s20 = sadd.s32 1, %s650_s15 }
   0x9   : > { %p29_p0 = scmp.ge.s32.totalorder %s28_s19, 2  ;;  %p78_p1 = scmp.ne.s32.totalorder %s634_s11, %s630_s10 }
   0xa   : > { %p79_p2 = scmp.eq.s32.totalorder %s437_s17, 3  ;;  %p84_p5 = scmp.ne.s32.totalorder %s630_s10, %s626_s9 }
   0xb   : > { %s915_s19 = smov (%p29_p0, %s28_s19), 0  ;;  %s917_s20 = smov (!%p29_p0, %s31_s20), %s650_s15 }
   0xc   : > { %s64_s21 = ssub.s32 %s646_s14, %s915_s19  ;;  %p724_p3 = por %p79_p2, %p78_p1 }
   0xd   : > { %p33_p4 = scmp.ge.s32.totalorder %s917_s20, 2  ;;  %p85_p6 = scmp.eq.s32.totalorder %s438_s18, 3 }
   0xe   : > { %p441_p7 = scmp.ge.s32.totalorder %s654_s16, 1  ;;  %p145_p9 = scmp.lt.s32.totalorder %s654_s16, 5 }
   0xf   : > { %s919_s20 = smov (%p33_p4, %s917_s20), 0  ;;  %p733_p8 = por %p85_p6, %p84_p5 }
  0x10   : > { %s63_s24 = ssub.s32 %s650_s15, %s919_s20  ;;  %s68_s25 = sadd.s32 1, %s634_s11 }
  0x11   : > { %s65_s26 = sor.u32 %s64_s21, %s63_s24  ;;  %p146_p10 = pnand %p441_p7, %p145_p9 }
  0x12   : > { %p66_p11 = scmp.eq.s32.totalorder %s65_s26, 0  ;;  %s442_s28 = sshll.u32 (!%p146_p10), %s638_s12, 3  ;;  %vm202_vm0 = vcmask (!%p146_p10), 64512   ;;  %vm240_vm1 = vcmask (!%p146_p10), 57344  }
  0x13   : > { %149 = sbr.rel (%p146_p10) target bundleno = 114 (0x72), region = 24  ;;  %p176_p12 = scmp.lt.s32.totalorder (!%p146_p10), %s642_s13, 1 }
  0x14   : > { %s742_s27 = scalar_select %p66_p11, %s634_s11, %s68_s25  }
  0x15   : > { %p178_p13 = scmp.lt.s32.totalorder (!%p146_p10), %s442_s28, 15  ;;  %s798_s17 = sand.u32 (!%p146_p10), 1, %s630_s10  }
  0x16   : > { %s446_s18 = sshll.u32 (!%p146_p10), %s642_s13, 1  ;;  %s168_s24 = scalar_lea.vmem (!%p146_p10), [#allocation2], %s798_s17 }
  0x17   : > { %s805_s21 = sadd.s32 (!%p146_p10), %s638_s12, %s446_s18  ;;  %s315_s25 = sshll.u32 (!%p146_p10), %s168_s24, 4  ;;  %s809_s25 = int_to_ptr.vmem [resolvable:$true] %s315_s25 }
  0x18   : > { %s447_s26 = sshll.u32 (!%p146_p10), %s805_s21, 4 }
  0x1a   : > { %s177_s29 = scalar_select %p176_p12, %s642_s13, 1 }
  0x1b   : > { %s921_s28 = smov (!%p178_p13, %s442_s28), 15 }
  0x1c   : > { %s444_s30 = sshll.u32 %s177_s29, 5  ;;  %s443_s3 = sshll.u32 %s921_s28, 1 }
  0x1d   : > { %s182_s4 = sadd.s32 %s444_s30, %s443_s3  ;;  %s816_s28 = scalar_lea.hbm %s903_s1, %s447_s26 }
  0x1e   : > { %s445_s5 = sshll.u32 %s182_s4, 3  ;;  %s297_s29 = scalar_lea.sflag [#allocation3], %s798_s17 }
  0x1f   : > { %s750_s8 = scalar_lea.vmem %s902_s0, %s445_s5  ;;  %s528_s30 = scalar_lea.vmem %s809_s25, 16 }
  0x20   : > { %v186_v0 = vld [vmem:[%s750_s8] sm:$0xff]  ;;  %v187_v1 = vld [vmem:[%s750_s8 + $0x8] sm:$0xff]  ;;  %v188_v2 = vld [vmem:[%s750_s8 + $0x10] sm:$0xff]  ;;  %p529_p0 = scmp.ne.s32.totalorder %s809_s25, %s528_s30  ;;  %s656_s3 = smov [#allocation2]  }
  0x21   : > { %v203_v3 = vsel %vm202_vm0, %v186_v0, 0.0  ;;  %v204_v4 = vsel %vm202_vm0, %v187_v1, 0.0  ;;  %v206_v5 = vsel %vm202_vm0, %v188_v2, 0.0  ;;  %v189_v6 = vld [vmem:[%s750_s8 + $0x18] sm:$0xff]  ;;  %v190_v9 = vld [vmem:[%s750_s8 + $0x20] sm:$0xff]  ;;  %v191_v12 = vld [vmem:[%s750_s8 + $0x28] sm:$0xff]  ;;  %v242_v14 = vmul.f32 %v186_v0, %v186_v0 }
  0x22   : > { %v205_v7 = vadd.f32 %v204_v4, %v203_v3  ;;  %v208_v8 = vsel %vm202_vm0, %v189_v6, 0.0  ;;  %v210_v11 = vsel %vm202_vm0, %v190_v9, 0.0  ;;  %v243_v15 = vmul.f32 %v187_v1, %v187_v1  ;;  %v192_v18 = vld [vmem:[%s750_s8 + $0x30] sm:$0xff]  ;;  %v193_v23 = vld [vmem:[%s750_s8 + $0x38] sm:$0xff]  ;;  %v194_v30 = vld [vmem:[%s750_s8 + $0x40] sm:$0xff]  ;;  %p530_p1 = pnand %p529_p0, %p724_p3  ;;  %s532_s4 = sshll.u32 %s656_s3, 4  ;;  %s533_s4 = int_to_ptr.vmem [resolvable:$false] %s532_s4 }
  0x23   : > { %v244_v16 = vmul.f32 %v188_v2, %v188_v2  ;;  %v212_v17 = vsel %vm202_vm0, %v191_v12, 0.0  ;;  %v245_v20 = vmul.f32 %v189_v6, %v189_v6  ;;  %v214_v21 = vsel %vm202_vm0, %v192_v18, 0.0  ;;  %v195_v36 = vld [vmem:[%s750_s8 + $0x48] sm:$0xff]  ;;  %v196_v42 = vld [vmem:[%s750_s8 + $0x50] sm:$0xff]  ;;  %v197_v48 = vld [vmem:[%s750_s8 + $0x58] sm:$0xff]  ;;  %s534_s5 = scalar_lea.vmem %s533_s4, 32  ;;  %p535_p4 = scmp.lt.s32.totalorder %s809_s25, %s533_s4 }
  0x24   : > { %v207_v10 = vadd.f32 %v206_v5, %v205_v7  ;;  %v246_v22 = vmul.f32 %v190_v9, %v190_v9  ;;  %v258_v25 = vsel %vm202_vm0, %v242_v14, 0.0  ;;  %v259_v26 = vsel %vm202_vm0, %v243_v15, 0.0  ;;  %v198_v54 = vld [vmem:[%s750_s8 + $0x60] sm:$0xff]  ;;  %v199_v60 = vld [vmem:[%s750_s8 + $0x68] sm:$0xff]  ;;  %v200_v2 = vld [vmem:[%s750_s8 + $0x70] sm:$0xff]  ;;  %p531_p2 = pneg %p530_p1  ;;  %p536_p5 = scmp.lt.s32.totalorder %s534_s5, %s528_s30 }
  0x25   : > { %v261_v27 = vsel %vm202_vm0, %v244_v16, 0.0  ;;  %v216_v28 = vsel %vm202_vm0, %v193_v23, 0.0  ;;  %v260_v29 = vadd.f32 %v259_v26, %v258_v25  ;;  %v247_v32 = vmul.f32 %v191_v12, %v191_v12 }
  0x26   : > { %v209_v13 = vadd.f32 %v208_v8, %v207_v10  ;;  %v263_v33 = vsel %vm202_vm0, %v245_v20, 0.0  ;;  %v218_v34 = vsel %vm202_vm0, %v194_v30, 0.0  ;;  %v248_v38 = vmul.f32 %v192_v18, %v192_v18  ;;  %v201_v8 = vld [vmem:[%s750_s8 + $0x78] sm:$0xff]  ;;  %p537_p6 = por %p536_p5, %p535_p4 }
  0x27   : > { %v262_v35 = vadd.f32 %v261_v27, %v260_v29  ;;  %v265_v39 = vsel %vm202_vm0, %v246_v22, 0.0  ;;  %v220_v40 = vsel %vm202_vm0, %v195_v36, 0.0  ;;  %v249_v44 = vmul.f32 %v193_v23, %v193_v23 }
  0x28   : > { %v211_v19 = vadd.f32 %v210_v11, %v209_v13  ;;  %v267_v45 = vsel %vm202_vm0, %v247_v32, 0.0  ;;  %v222_v46 = vsel %vm202_vm0, %v196_v42, 0.0  ;;  %v250_v50 = vmul.f32 %v194_v30, %v194_v30  ;;  %p538_p7 = pnand %p537_p6, %p531_p2 }
  0x29   : > { %v264_v41 = vadd.f32 %v263_v33, %v262_v35  ;;  %v269_v51 = vsel %vm202_vm0, %v248_v38, 0.0  ;;  %v224_v52 = vsel %vm202_vm0, %v197_v48, 0.0  ;;  %v251_v56 = vmul.f32 %v195_v36, %v195_v36 }
  0x2a   : > { %v213_v24 = vadd.f32 %v212_v17, %v211_v19  ;;  %v271_v57 = vsel %vm202_vm0, %v249_v44, 0.0  ;;  %v226_v58 = vsel %vm202_vm0, %v198_v54, 0.0  ;;  %v252_v62 = vmul.f32 %v196_v42, %v196_v42 }
  0x2b   : > { %v266_v47 = vadd.f32 %v265_v39, %v264_v41  ;;  %v273_v63 = vsel %vm202_vm0, %v250_v50, 0.0  ;;  %v228_v0 = vsel %vm202_vm0, %v199_v60, 0.0  ;;  %v253_v4 = vmul.f32 %v197_v48, %v197_v48 }
  0x2c   : > { %v215_v31 = vadd.f32 %v214_v21, %v213_v24  ;;  %v275_v5 = vsel %vm202_vm0, %v251_v56, 0.0  ;;  %v230_v6 = vsel %vm202_vm0, %v200_v2, 0.0  ;;  %v254_v10 = vmul.f32 %v198_v54, %v198_v54 }
  0x2d   : > { %v268_v53 = vadd.f32 %v267_v45, %v266_v47  ;;  %v277_v11 = vsel %vm202_vm0, %v252_v62, 0.0  ;;  %v232_v12 = vsel %vm202_vm0, %v201_v8, 0.0  ;;  %v255_v15 = vmul.f32 %v199_v60, %v199_v60 }
  0x2e   : > { %v217_v37 = vadd.f32 %v216_v28, %v215_v31  ;;  %v279_v16 = vsel %vm202_vm0, %v253_v4, 0.0  ;;  %v256_v19 = vmul.f32 %v200_v2, %v200_v2  ;;  %v281_v20 = vsel %vm202_vm0, %v254_v10, 0.0 }
  0x2f   : > { %v270_v59 = vadd.f32 %v269_v51, %v268_v53  ;;  %v257_v23 = vmul.f32 %v201_v8, %v201_v8  ;;  %v283_v24 = vsel %vm202_vm0, %v255_v15, 0.0 }
  0x30   : > { %v219_v43 = vadd.f32 %v218_v34, %v217_v37  ;;  %v285_v27 = vsel %vm202_vm0, %v256_v19, 0.0 }
  0x31   : > { %v272_v1 = vadd.f32 %v271_v57, %v270_v59  ;;  %v287_v30 = vsel %vm202_vm0, %v257_v23, 0.0 }
  0x32   : > { %v221_v49 = vadd.f32 %v220_v40, %v219_v43 }
  0x33   : > { %v274_v7 = vadd.f32 %v273_v63, %v272_v1 }
  0x34   : > { %v223_v55 = vadd.f32 %v222_v46, %v221_v49 }
  0x35   : > { %v276_v13 = vadd.f32 %v275_v5, %v274_v7 }
  0x36   : > { %v225_v61 = vadd.f32 %v224_v52, %v223_v55 }
  0x37   : > { %v278_v17 = vadd.f32 %v277_v11, %v276_v13 }
  0x38   : > { %v227_v3 = vadd.f32 %v226_v58, %v225_v61 }
  0x39   : > { %v280_v21 = vadd.f32 %v279_v16, %v278_v17 }
  0x3a   : > { %v229_v9 = vadd.f32 %v228_v0, %v227_v3 }
  0x3b   : > { %v282_v25 = vadd.f32 %v281_v20, %v280_v21 }
  0x3c   : > { %v231_v14 = vadd.f32 %v230_v6, %v229_v9 }
  0x3d   : > { %v284_v28 = vadd.f32 %v283_v24, %v282_v25 }
  0x3e   : > { %v233_v18 = vadd.f32 %v232_v12, %v231_v14 }
  0x3f   : > { %v286_v31 = vadd.f32 %v285_v27, %v284_v28 }
  0x40   : > { %v234_v22 = vrot.slane %v233_v18, 4 }
  0x41   : > { %v288_v33 = vadd.f32 %v287_v30, %v286_v31 }
  0x42   : > { %v235_v26 = vadd.f32 %v234_v22, %v233_v18 }
  0x43   : > { %v289_v35 = vrot.slane %v288_v33, 4 }
  0x44   : > { %v236_v29 = vrot.slane %v235_v26, 2 }
  0x45   : > { %v290_v37 = vadd.f32 %v289_v35, %v288_v33 }
  0x46   : > { %v237_v32 = vadd.f32 %v236_v29, %v235_v26 }
  0x47   : > { %v291_v38 = vrot.slane %v290_v37, 2 }
  0x48   : > { %v238_v34 = vrot.slane %v237_v32, 1 }
  0x4a   : > { %v239_v36 = vadd.f32 %v238_v34, %v237_v32 }
  0x4c   : > { %241 = vst.msk [vmem:[%s168_s24] sm:$0x1] %vm240_vm1, %v239_v36 }
  0x4d   : > { %541 = shalt.err (!%p538_p7)
}
  0x4e   : > { %s542_s6 = scalar_lea.hbm %s816_s28, 16  ;;  %s546_s18 = scalar_lea.hbm %s903_s1, 64 }
  0x4f   : > { %p543_p9 = scmp.ne.s32.totalorder %s816_s28, %s542_s6  ;;  %p547_p12 = scmp.lt.u32.totalorder %s816_s28, %s903_s1 }
  0x50   : > { %p548_p13 = scmp.lt.u32.totalorder %s546_s18, %s542_s6  ;;  %p550_p1 = scmp.lt.u32.totalorder %s542_s6, %s816_s28 }
  0x51   : > { %p544_p10 = pnand %p543_p9, %p724_p3 }
  0x52   : > { %p549_p0 = por %p548_p13, %p547_p12 }
  0x53   : > { %p545_p11 = pneg %p544_p10 }
  0x54   : > { %p551_p2 = por %p550_p1, %p549_p0 }
  0x56   : > { %p552_p4 = pnand %p551_p2, %p545_p11 }
  0x58   : > { %555 = shalt.err (!%p552_p4)
}
  0x59   : > { %452 = dma.vmem_to_hbm [thread:$0]  (%p724_p3), %s809_s25, 16, %s816_s28, %s297_s29   ;;  %v292_v39 = vadd.f32 %v291_v38, %v290_v37 }
  0x5a   : > { %s174_s13 = scalar_lea.vmem [#allocation4], %s798_s17  ;;  %s849_s5 = scalar_lea.hbm %s904_s2, %s447_s26 }
  0x5b   : > { %s330_s30 = sshll.u32 %s174_s13, 4  ;;  %v293_v40 = vrot.slane %v292_v39, 1  ;;  %s301_s6 = scalar_lea.sflag [#allocation5], %s798_s17  ;;  %s842_s30 = int_to_ptr.vmem [resolvable:$true] %s330_s30 }
  0x5c   : > { %s556_s25 = scalar_lea.vmem %s842_s30, 16  ;;  %s657_s28 = smov [#allocation4]  }
  0x5d   : > { %v294_v41 = vadd.f32 %v293_v40, %v292_v39  ;;  %p557_p5 = scmp.ne.s32.totalorder %s842_s30, %s556_s25  ;;  %s560_s29 = sshll.u32 %s657_s28, 4  ;;  %s561_s29 = int_to_ptr.vmem [resolvable:$false] %s560_s29 }
  0x5e   : > { %s562_s7 = scalar_lea.vmem %s561_s29, 32  ;;  %p563_p9 = scmp.lt.s32.totalorder %s842_s30, %s561_s29 }
  0x5f   : > { %295 = vst.msk [vmem:[%s174_s13] sm:$0x1] %vm240_vm1, %v294_v41  ;;  %p558_p6 = pnand %p557_p5, %p724_p3  ;;  %p564_p10 = scmp.lt.s32.totalorder %s562_s7, %s556_s25 }
  0x61   : > { %p559_p7 = pneg %p558_p6  ;;  %p565_p11 = por %p564_p10, %p563_p9 }
  0x63   : > { %p566_p12 = pnand %p565_p11, %p559_p7 }
  0x65   : > { %569 = shalt.err (!%p566_p12)
}
  0x66   : > { %s570_s17 = scalar_lea.hbm %s849_s5, 16  ;;  %s574_s8 = scalar_lea.hbm %s904_s2, 64 }
  0x67   : > { %p571_p13 = scmp.ne.s32.totalorder %s849_s5, %s570_s17  ;;  %p575_p2 = scmp.lt.u32.totalorder %s849_s5, %s904_s2 }
  0x68   : > { %p576_p4 = scmp.lt.u32.totalorder %s574_s8, %s570_s17  ;;  %p578_p6 = scmp.lt.u32.totalorder %s570_s17, %s849_s5 }
  0x69   : > { %p572_p0 = pnand %p571_p13, %p724_p3 }
  0x6a   : > { %p577_p5 = por %p576_p4, %p575_p2 }
  0x6b   : > { %p573_p1 = pneg %p572_p0 }
  0x6c   : > { %p579_p7 = por %p578_p6, %p577_p5 }
  0x6e   : > { %p580_p9 = pnand %p579_p7, %p573_p1 }
  0x70   : > { %583 = shalt.err (!%p580_p9)
}
  0x71   : > { %453 = dma.vmem_to_hbm [thread:$0]  (%p724_p3), %s842_s30, 16, %s849_s5, %s301_s6  }
  0x72 PF: > { %p463_p10 = scmp.ge.s32.totalorder %s654_s16, 2  ;;  %s342_s12 = sand.u32 1, %s626_s9  }
  0x73   : > { %s343_s13 = scalar_lea.sflag [#allocation3], %s342_s12 }
  0x74   : > { %p457_p11 = pnand %p463_p10, %p733_p8 }
  0x76   : > { %617 = dma.done.wait (!%p457_p11), %s343_s13, 16  }
  0x77   : > { %619 = vsyncadd (!%p457_p11), %s343_s13, 4294967280  ;;  %s351_s3 = scalar_lea.sflag [#allocation5], %s342_s12 }
  0x78   : > { %621 = dma.done.wait (!%p457_p11), %s351_s3, 16  }
  0x79   : > { %623 = vsyncadd (!%p457_p11), %s351_s3, 4294967280  ;;  %s19_s16 = sadd.s32 1, %s654_s16   ;;  %s907_s9 = smov %s630_s10 }
  0x7a   : > { %p16_p12 = scmp.ge.s32.totalorder %s19_s16, 6   ;;  %s908_s10 = smov %s634_s11 }
  0x7b   : > { %s909_s11 = smov %s742_s27  ;;  %s910_s12 = smov %s646_s14 }
  0x7c   : > { %s911_s13 = smov %s650_s15  ;;  %s912_s14 = smov %s915_s19 }
  0x7d   : > { %s913_s15 = smov %s919_s20  ;;  %18 = sbr.rel (!%p16_p12) target bundleno = 7 (0x7), region = 76 }
  0x84   :  { %355 = vsyncpa [#allocation3], 1 }
  0x85   :  { %357 = vsyncpa [#allocation3 + $0x1], 1 }
  0x86   :  { %358 = vsyncpa [#allocation5], 1 }
  0x87   :  { %360 = vsyncpa [#allocation5 + $0x1], 1 }

</bundles_post_ra>
